<compile_context>
chip_gen: v5e
topology: v5e:2x2
jax: 0.10.0
libtpu: 0.0.40
codegen_flags: <defaults>
</compile_context>

<pallas_src>
import jax
import jax.numpy as jnp
from jax.experimental import pallas as pl
from jax.experimental.pallas import tpu as pltpu


_LANE = 128              # TPU lane width
_MAX_GROUP_UNROLL = 32   # max rows folded together in the grouped small-L path


def _sublane_pack(itemsize: int) -> int:
    # Sublane packing per dtype width (rows per vreg sublane group).
    return {4: 8, 2: 16, 1: 32}.get(itemsize, 8)


def _vmem_budget():
    """(bytes per block buffer, scoped-VMEM limit), chosen per TPU generation."""
    buf, limit = 4 << 20, 32 << 20          # v5e / v6e default (128 MiB VMEM)
    try:
        cap = pltpu.get_tpu_info().vmem_capacity_bytes
    except Exception:
        cap = None
    if cap is not None and cap <= (80 << 20):
        # v7x-class: only 64 MiB VMEM but ~2.3x faster HBM -> bigger tiles to
        # amortise the fixed per-grid-step overhead.  Double-buffered in+out
        # footprint = 4 x 6 MiB = 24 MiB, well under the 44 MiB limit.
        buf, limit = 6 << 20, 44 << 20
    return buf, limit


def _round_up(v: int, m: int) -> int:
    return ((v + m - 1) // m) * m


def _row_tile(num_rows, row_bytes, pack, buf_bytes, ensure_two_blocks):
    """Largest legal row tile: multiple of the sublane packing, one block buffer
    stays within buf_bytes, and (optionally) at least 2 row blocks exist so both
    v7x TensorCores get work."""
    max_rows = buf_bytes // max(1, row_bytes)
    max_rows = max(pack, (max_rows // pack) * pack)
    if ensure_two_blocks and num_rows > 2 * pack:
        half = _round_up(pl.cdiv(num_rows, 2), pack)
        max_rows = min(max_rows, half)
    return num_rows if num_rows <= max_rows else max_rows


def _pick_group(rows, l_out):
    """Divisor G of `rows` used to widen the output lane dim to G*l_out.
    Prefer G*l_out a multiple of 128 (unmasked stores), then >= 128, then as
    wide as possible.  Returns None if no divisor in [2, 32] exists."""
    best_aligned = best_wide = best_any = None
    for g in range(2, min(rows, _MAX_GROUP_UNROLL) + 1):
        if rows % g:
            continue
        w = g * l_out
        if best_aligned is None and w % _LANE == 0:
            best_aligned = g
        if best_wide is None and w >= _LANE:
            best_wide = g
        best_any = g
    return best_aligned or best_wide or best_any


def _pick_lane_tile(l_out, itemsize):
    """Lane-block width (multiple of 128) for the 2-D tiled path: dtype-scaled
    target, candidate chosen to minimise the ragged remainder of l_out."""
    scale = max(1, 4 // itemsize)            # 512 f32 / 1024 bf16 / 2048 int8
    cands = [c * scale for c in (256, 384, 512, 640, 768)]
    max_tile = (l_out // _LANE) * _LANE
    cands = [c for c in cands if c <= max_tile]
    if not cands:
        return max_tile
    best = None
    for c in cands:
        rem = l_out % c
        waste = 0 if rem == 0 else c - rem   # masked lanes in the ragged last column
        key = (waste, -c)                    # least waste, then biggest tile
        if best is None or key < best[0]:
            best = (key, c)
    return best[1]


def _copy_kernel(x_ref, o_ref):
    # Pure block copy; the chomp lives entirely in the BlockSpecs/grid.
    o_ref[...] = x_ref[...]


def _make_prefix_kernel(l_out):
    def kernel(x_ref, o_ref):
        o_ref[...] = x_ref[:, :l_out]        # static prefix slice inside VMEM
    return kernel


def _make_grouped_kernel(g, l, l_out):
    def kernel(x_ref, o_ref):
        for k in range(g):                   # static unroll, g <= 32
            o_ref[:, k * l_out:(k + 1) * l_out] = x_ref[:, k * l:k * l + l_out]
    return kernel


def chomp1d(x: jax.Array, chomp_size: int, *,
            buffer_bytes: int | None = None,
            vmem_limit_bytes: int | None = None) -> jax.Array:
    """x: (N, C, L) -> (N, C, L - chomp_size), same dtype.

    Matches PyTorch ``x[:, :, :-chomp_size].contiguous()`` for chomp_size > 0.
    (PyTorch's ``:-0`` would return an empty tensor; that degenerate case is
    rejected here rather than silently reproduced.)
    """
    n, c, l = x.shape
    assert 0 < chomp_size < l, "chomp_size must be in (0, L)"
    l_out = l - chomp_size
    rows = n * c
    itemsize = jnp.dtype(x.dtype).itemsize
    pack = _sublane_pack(itemsize)

    buf_default, limit_default = _vmem_budget()
    buf_bytes = buffer_bytes or buf_default
    vmem_limit = vmem_limit_bytes or limit_default

    x2d = x.reshape(rows, l)                 # free: x is contiguous
    # Narrowest legal input block width covering the kept columns: next
    # multiple of 128 (or full extent).  Bounds the wasted read of the tail.
    in_w = min(l, _round_up(l_out, _LANE))

    # ---- Path 1: grouped repack for l_out < 128 (kill narrow masked stores).
    g = _pick_group(rows, l_out) if l_out < _LANE else None
    if g is not None and g * l * itemsize * pack <= buf_bytes:
        rows_g = rows // g
        xg = x2d.reshape(rows_g, g * l)      # free reshape, row-major grouping
        tile_r = _row_tile(rows_g, g * l * itemsize, pack, buf_bytes, True)
        out2d = pl.pallas_call(
            _make_grouped_kernel(g, l, l_out),
            out_shape=jax.ShapeDtypeStruct((rows_g, g * l_out), x.dtype),
            grid=(pl.cdiv(rows_g, tile_r),),
            in_specs=[pl.BlockSpec((tile_r, g * l), lambda i: (i, 0))],
            out_specs=pl.BlockSpec((tile_r, g * l_out), lambda i: (i, 0)),
            compiler_params=pltpu.CompilerParams(
                dimension_semantics=("parallel",),
                vmem_limit_bytes=vmem_limit,
            ),
        )(xg)
        return out2d.reshape(n, c, l_out)

    # ---- Path 2: 1-D grid over rows, single lane block spanning all of l_out.
    if l_out < _LANE or in_w * itemsize * pack <= buf_bytes:
        tile_r = _row_tile(rows, in_w * itemsize, pack, buf_bytes, True)
        kernel = _copy_kernel if in_w == l_out else _make_prefix_kernel(l_out)
        out2d = pl.pallas_call(
            kernel,
            out_shape=jax.ShapeDtypeStruct((rows, l_out), x.dtype),
            grid=(pl.cdiv(rows, tile_r),),
            in_specs=[pl.BlockSpec((tile_r, in_w), lambda i: (i, 0))],
            out_specs=pl.BlockSpec((tile_r, l_out), lambda i: (i, 0)),
            compiler_params=pltpu.CompilerParams(
                dimension_semantics=("parallel",),
                vmem_limit_bytes=vmem_limit,
            ),
        )(x2d)
        return out2d.reshape(n, c, l_out)

    # ---- Path 3: 2-D lane-tiled path for very long rows.
    lane_tile = _pick_lane_tile(l_out, itemsize)
    tile_r = _row_tile(rows, lane_tile * itemsize, pack, buf_bytes, False)
    out2d = pl.pallas_call(
        _copy_kernel,
        out_shape=jax.ShapeDtypeStruct((rows, l_out), x.dtype),
        grid=(pl.cdiv(rows, tile_r), pl.cdiv(l_out, lane_tile)),
        # TODO(synk): if profiling shows exposed DMA at the ragged boundary
        # tile, add pipeline_mode=pl.Buffered(3) on the input spec.
        in_specs=[pl.BlockSpec((tile_r, lane_tile), lambda i, j: (i, j))],
        out_specs=pl.BlockSpec((tile_r, lane_tile), lambda i, j: (i, j)),
        compiler_params=pltpu.CompilerParams(
            dimension_semantics=("parallel", "parallel"),
            vmem_limit_bytes=vmem_limit,
        ),
    )(x2d)
    return out2d.reshape(n, c, l_out)


if __name__ == "__main__":
    key = jax.random.PRNGKey(0)

    # 1) Original small demo shape: l_out = 13 < 128 -> grouped repack path.
    x_small = jax.random.normal(key, (2, 4, 16), dtype=jnp.float32)
    out_small = jax.block_until_ready(chomp1d(x_small, 3))
    ref_small = x_small[:, :, :-3]
    assert out_small.shape == ref_small.shape and out_small.dtype == x_small.dtype
    assert jnp.array_equal(out_small, ref_small), "grouped-path mismatch"

    # 2) Grouped path with an exactly-128-aligned group (l_out=32, G=4 -> 128).
    key, k1 = jax.random.split(key)
    x_grp = jax.random.normal(k1, (2, 8, 40), dtype=jnp.float32)
    out_grp = jax.block_until_ready(chomp1d(x_grp, 8))
    ref_grp = x_grp[:, :, :-8]
    assert out_grp.shape == ref_grp.shape and out_grp.dtype == x_grp.dtype
    assert jnp.array_equal(out_grp, ref_grp), "aligned grouped-path mismatch"

    # 3) 1-D row path, ragged kept width (l_out = 255, input block width 256).
    key, k2 = jax.random.split(key)
    x_lane = jax.random.normal(k2, (2, 4, 272), dtype=jnp.float32)
    out_lane = jax.block_until_ready(chomp1d(x_lane, 17))
    ref_lane = x_lane[:, :, :-17]
    assert out_lane.shape == ref_lane.shape and out_lane.dtype == x_lane.dtype
    assert jnp.array_equal(out_lane, ref_lane), "1D-path (ragged l_out) mismatch"

    # 4) 1-D row path, tail-free variant (l_out = 256 is a multiple of 128).
    key, k3 = jax.random.split(key)
    x_al = jax.random.normal(k3, (2, 4, 300), dtype=jnp.float32)
    out_al = jax.block_until_ready(chomp1d(x_al, 44))
    ref_al = x_al[:, :, :-44]
    assert out_al.shape == ref_al.shape and out_al.dtype == x_al.dtype
    assert jnp.array_equal(out_al, ref_al), "1D-path (aligned l_out) mismatch"

    # 5) bf16, 1-D row path with full-width input block (l = 150, l_out = 148).
    key, k4 = jax.random.split(key)
    x_edge = jax.random.normal(k4, (2, 4, 150), dtype=jnp.bfloat16)
    out_edge = jax.block_until_ready(chomp1d(x_edge, 2))
    ref_edge = x_edge[:, :, :-2]
    assert out_edge.shape == ref_edge.shape and out_edge.dtype == x_edge.dtype
    assert jnp.array_equal(out_edge, ref_edge), "1D-path (bf16) mismatch"

    # 6) 2-D lane-tiled path, exercised via a small forced buffer budget.
    key, k5 = jax.random.split(key)
    x_big = jax.random.normal(k5, (4, 4, 3000), dtype=jnp.float32)
    out_big = jax.block_until_ready(chomp1d(x_big, 100, buffer_bytes=64 * 1024))
    ref_big = x_big[:, :, :-100]
    assert out_big.shape == ref_big.shape and out_big.dtype == x_big.dtype
    assert jnp.array_equal(out_big, ref_big), "2D-tiled-path mismatch"

    print("KERNEL_OK")
</pallas_src>

<mosaic_0001>
module attributes {stable_mosaic.version = 11 : i64} {
  func.func @kernel(%arg0: i32, %arg1: memref<1x128xf32, #tpu.memory_space<vmem>>, %arg2: memref<1x104xf32, #tpu.memory_space<vmem>>) attributes {dimension_semantics = [#tpu.dimension_semantics<parallel>], iteration_bounds = array<i64: 1>, scalar_prefetch = 0 : i64, scratch_operands = 0 : i64, tpu.core_type = #tpu.core_type<tc>, window_params = [{transform_indices = @transform_0, window_bounds = array<i64: 1, 128>}, {transform_indices = @transform_1, window_bounds = array<i64: 1, 104>}]} {
    %c0 = arith.constant 0 : index
    %c0_0 = arith.constant 0 : index
    %0 = vector.load %arg1[%c0, %c0_0] : memref<1x128xf32, #tpu.memory_space<vmem>>, vector<1x13xf32>
    %c0_1 = arith.constant 0 : index
    %c0_2 = arith.constant 0 : index
    %1 = vector.load %arg2[%c0_1, %c0_2] : memref<1x104xf32, #tpu.memory_space<vmem>>, vector<1x13xf32>
    tpu.vector_store %arg2[%c0_1, %c0_2], %0 {strides = array<i32>} : memref<1x104xf32, #tpu.memory_space<vmem>>, vector<1x13xf32>,
    %c0_3 = arith.constant 0 : index
    %c16 = arith.constant 16 : index
    %2 = vector.load %arg1[%c0_3, %c16] : memref<1x128xf32, #tpu.memory_space<vmem>>, vector<1x13xf32>
    %c0_4 = arith.constant 0 : index
    %c13 = arith.constant 13 : index
    %3 = vector.load %arg2[%c0_4, %c13] : memref<1x104xf32, #tpu.memory_space<vmem>>, vector<1x13xf32>
    tpu.vector_store %arg2[%c0_4, %c13], %2 {strides = array<i32>} : memref<1x104xf32, #tpu.memory_space<vmem>>, vector<1x13xf32>,
    %c0_5 = arith.constant 0 : index
    %c32 = arith.constant 32 : index
    %4 = vector.load %arg1[%c0_5, %c32] : memref<1x128xf32, #tpu.memory_space<vmem>>, vector<1x13xf32>
    %c0_6 = arith.constant 0 : index
    %c26 = arith.constant 26 : index
    %5 = vector.load %arg2[%c0_6, %c26] : memref<1x104xf32, #tpu.memory_space<vmem>>, vector<1x13xf32>
    tpu.vector_store %arg2[%c0_6, %c26], %4 {strides = array<i32>} : memref<1x104xf32, #tpu.memory_space<vmem>>, vector<1x13xf32>,
    %c0_7 = arith.constant 0 : index
    %c48 = arith.constant 48 : index
    %6 = vector.load %arg1[%c0_7, %c48] : memref<1x128xf32, #tpu.memory_space<vmem>>, vector<1x13xf32>
    %c0_8 = arith.constant 0 : index
    %c39 = arith.constant 39 : index
    %7 = vector.load %arg2[%c0_8, %c39] : memref<1x104xf32, #tpu.memory_space<vmem>>, vector<1x13xf32>
    tpu.vector_store %arg2[%c0_8, %c39], %6 {strides = array<i32>} : memref<1x104xf32, #tpu.memory_space<vmem>>, vector<1x13xf32>,
    %c0_9 = arith.constant 0 : index
    %c64 = arith.constant 64 : index
    %8 = vector.load %arg1[%c0_9, %c64] : memref<1x128xf32, #tpu.memory_space<vmem>>, vector<1x13xf32>
    %c0_10 = arith.constant 0 : index
    %c52 = arith.constant 52 : index
    %9 = vector.load %arg2[%c0_10, %c52] : memref<1x104xf32, #tpu.memory_space<vmem>>, vector<1x13xf32>
    tpu.vector_store %arg2[%c0_10, %c52], %8 {strides = array<i32>} : memref<1x104xf32, #tpu.memory_space<vmem>>, vector<1x13xf32>,
    %c0_11 = arith.constant 0 : index
    %c80 = arith.constant 80 : index
    %10 = vector.load %arg1[%c0_11, %c80] : memref<1x128xf32, #tpu.memory_space<vmem>>, vector<1x13xf32>
    %c0_12 = arith.constant 0 : index
    %c65 = arith.constant 65 : index
    %11 = vector.load %arg2[%c0_12, %c65] : memref<1x104xf32, #tpu.memory_space<vmem>>, vector<1x13xf32>
    tpu.vector_store %arg2[%c0_12, %c65], %10 {strides = array<i32>} : memref<1x104xf32, #tpu.memory_space<vmem>>, vector<1x13xf32>,
    %c0_13 = arith.constant 0 : index
    %c96 = arith.constant 96 : index
    %12 = vector.load %arg1[%c0_13, %c96] : memref<1x128xf32, #tpu.memory_space<vmem>>, vector<1x13xf32>
    %c0_14 = arith.constant 0 : index
    %c78 = arith.constant 78 : index
    %13 = vector.load %arg2[%c0_14, %c78] : memref<1x104xf32, #tpu.memory_space<vmem>>, vector<1x13xf32>
    tpu.vector_store %arg2[%c0_14, %c78], %12 {strides = array<i32>} : memref<1x104xf32, #tpu.memory_space<vmem>>, vector<1x13xf32>,
    %c0_15 = arith.constant 0 : index
    %c112 = arith.constant 112 : index
    %14 = vector.load %arg1[%c0_15, %c112] : memref<1x128xf32, #tpu.memory_space<vmem>>, vector<1x13xf32>
    %c0_16 = arith.constant 0 : index
    %c91 = arith.constant 91 : index
    %15 = vector.load %arg2[%c0_16, %c91] : memref<1x104xf32, #tpu.memory_space<vmem>>, vector<1x13xf32>
    tpu.vector_store %arg2[%c0_16, %c91], %14 {strides = array<i32>} : memref<1x104xf32, #tpu.memory_space<vmem>>, vector<1x13xf32>,
    return
  }
  func.func @transform_0(%arg0: i32) -> (i32, i32) {
    %c0_i32 = arith.constant 0 : i32
    %c0_i32_0 = arith.constant 0 : i32
    return %arg0, %c0_i32 : i32, i32
  }
  func.func @transform_1(%arg0: i32) -> (i32, i32) {
    %c0_i32 = arith.constant 0 : i32
    %c0_i32_0 = arith.constant 0 : i32
    return %arg0, %c0_i32 : i32, i32
  }
}

</mosaic_0001>

<bundles_post_ra>
// kernel: tpu_custom_call.1
= control target key start
LH: loop header
LB: loop body
LE: loop exit
PB: predicated region body
PF: predicated region fallthrough
CT: control target
= control target key end

     0   :  { %6 = vsyncpa [#allocation3], 0  ;;  %s192_s0 = inlined_call_operand.hbm [shape: f32[1,128], index: 0, kind: input, shape index: {}]   ;;  %s193_s1 = inlined_call_operand.hbm [shape: f32[1,104], index: 1, kind: output, shape index: {}]  }
   0x1   :  { %7 = vsyncpa [#allocation4], 0  ;;  %s13_s8 = sshll.u32 %s192_s0, 4  ;;  %s167_s9 = smov [#allocation2]   ;;  %s14_s8 = int_to_ptr.hbm [resolvable:$true] %s13_s8 }
   0x2   :  { %s15_s10 = sshll.u32 %s167_s9, 4  ;;  %s16_s10 = int_to_ptr.vmem [resolvable:$true] %s15_s10 }
   0x3   :  { %18 = dma.hbm_to_vmem [thread:$0]  %s14_s8, 16, %s16_s10, [#allocation3]  }
   0x4   :  { %163 = dma.done.wait [#allocation3], 16  }
   0x5   :  { %164 = vsyncadd [#allocation3], 4294967280  ;;  %v108_v0 = vld [vmem:[#allocation2] ss:$0 sm:$0xff]  ;;  %s168_s11 = smov 125   ;;  %s169_s12 = smov 119  }
   0x6   :  { %v109_v1 = vld [vmem:[#allocation2] ss:$0 sm:$0xff]  ;;  %29 = vrot.lane.b32.xlu0 %v108_v0, %s168_s11  ;;  %s170_s13 = smov 113   ;;  %s171_s0 = smov 122   ;;  %vm24_vm0 = vcmask 98304   ;;  %vm32_vm1 = vcmask 204904  }
   0x7   :  { %45 = vrot.lane.b32.xlu1 %v109_v1, %s169_s12  ;;  %v113_v2 = vld [vmem:[#allocation2] ss:$0 sm:$0xff]  ;;  %s172_s14 = smov 116   ;;  %s173_s15 = smov 110   ;;  %vm40_vm2 = vcmask 311504   ;;  %vm48_vm3 = vcmask 418104  }
   0x8   :  { %61 = vrot.lane.b32.xlu2 %v113_v2, %s170_s13  ;;  %v110_v3 = vld [vmem:[#allocation2] ss:$0 sm:$0xff]  ;;  %s174_s16 = smov 107   ;;  %vm56_vm4 = vcmask 524704   ;;  %vm64_vm5 = vcmask 631304   ;;  %vm72_vm6 = vcmask 737904  }
   0x9   :  { %v111_v4 = vld [vmem:[#allocation2] ss:$0 sm:$0xff]  ;;  %s175_s17 = smov [#allocation5]   ;;  %s89_s21 = sshll.u32 %s193_s1, 4  ;;  %vm80_vm7 = vcmask 844504   ;;  %s90_s21 = int_to_ptr.hbm [resolvable:$true] %s89_s21 }
   0xa   :  { %v114_v5 = vld [vmem:[#allocation2] ss:$0 sm:$0xff]  ;;  %s87_s18 = sshll.u32 %s175_s17, 4  ;;  %s88_s18 = int_to_ptr.vmem [resolvable:$true] %s87_s18 }
   0xb   :  { %v112_v6 = vld [vmem:[#allocation2] ss:$0 sm:$0xff] }
   0xc   :  { %v23_v7 = vld [vmem:[#allocation2] sm:$0x1] }
   0xd   :  { %25 = vst.msk [vmem:[#allocation5] sm:$0x1] %vm24_vm0, %v23_v7 }
   0xe   :  { %37 = vrot.lane.b32.xlu0 %v110_v3, %s171_s0 }
   0xf   :  { %53 = vrot.lane.b32.xlu1 %v111_v4, %s172_s14 }
  0x10   :  { %69 = vrot.lane.b32.xlu2 %v114_v5, %s173_s15 }
  0x16   :  { %77 = vrot.lane.b32.xlu0 %v112_v6, %s174_s16 }
  0x62   :  { %v62_v9 = vpop.permute.xlu2 %61 }
  0x6a   :  { %v70_v13 = vpop.permute.xlu2 %69 }
  0x78   :  { %v30_v8 = vpop.permute.xlu0 %29 }
  0x79   :  { %33 = vst.msk [vmem:[#allocation5] sm:$0x1] %vm32_vm1, %v30_v8  ;;  %v46_v10 = vpop.permute.xlu1 %45 }
  0x80   :  { %v38_v11 = vpop.permute.xlu0 %37 }
  0x81   :  { %41 = vst.msk [vmem:[#allocation5] sm:$0x1] %vm40_vm2, %v38_v11  ;;  %v54_v12 = vpop.permute.xlu1 %53 }
  0x82   :  { %49 = vst.msk [vmem:[#allocation5] sm:$0x1] %vm48_vm3, %v46_v10 }
  0x83   :  { %57 = vst.msk [vmem:[#allocation5] sm:$0x1] %vm56_vm4, %v54_v12 }
  0x84   :  { %65 = vst.msk [vmem:[#allocation5] sm:$0x1] %vm64_vm5, %v62_v9 }
  0x85   :  { %73 = vst.msk [vmem:[#allocation5] sm:$0x1] %vm72_vm6, %v70_v13 }
  0x88   :  { %v78_v14 = vpop.permute.xlu0 %77 }
  0x89   :  { %81 = vst.msk [vmem:[#allocation5] sm:$0x1] %vm80_vm7, %v78_v14 }
  0x8a   :  { %92 = dma.vmem_to_hbm [thread:$0]  %s88_s18, 16, %s90_s21, [#allocation4]  }
  0x8b   :  { %165 = dma.done.wait [#allocation4], 16  }
  0x8c   :  { %166 = vsyncadd [#allocation4], 4294967280 }
  0x8d   :  { %97 = vsyncpa [#allocation3], 1 }
  0x8e   :  { %98 = vsyncpa [#allocation4], 1 }

</bundles_post_ra>
